<compile_context>
chip_gen: v7x
topology: tpu7x:2x2x1
jax: 0.10.0
libtpu: 0.0.40
codegen_flags: <defaults>
</compile_context>

<pallas_src>
import functools

import jax
import jax.numpy as jnp
from jax.experimental import pallas as pl
from jax.experimental.pallas import tpu as pltpu


def _highpass_kernel(x_ref, m_ref, o_ref, *, W, c_center, c_scale):
    # x_ref/o_ref: (CB, HWp) blocks, lane-dense last dim (HWp % 128 == 0).
    # m_ref: (4, HWp) resident {0,1} f32 masks [right, left, down, up].
    n = x_ref.shape[-1]

    def pull(v, k):
        # out[..., p] = v[..., (p + k) mod n]  (cyclic pull along last axis)
        s = (-k) % n
        return v if s == 0 else pltpu.roll(v, shift=s, axis=1)

    x = x_ref[...]
    # Horizontal neighbours shifted on the NATIVE dtype (cheaper XLU for bf16).
    xr = pull(x, 1)        # x[h, w+1] (cyclic)
    xl = pull(x, -1)       # x[h, w-1] (cyclic)

    m = m_ref[...]
    m_r = m[0:1, :]        # right neighbour exists (w < W-1)
    m_l = m[1:2, :]        # left  neighbour exists (w > 0)
    m_d = m[2:3, :]        # lower neighbour exists (h < H-1)
    m_u = m[3:4, :]        # upper neighbour exists (h > 0)

    xf = x.astype(jnp.float32)
    # 3-tap horizontal sum with zero padding at the row edges ...
    r = xf + xr.astype(jnp.float32) * m_r + xl.astype(jnp.float32) * m_l
    # ... then 3-tap vertical sum of the row sums -> 3x3 box sum (incl. centre).
    b = r + pull(r, W) * m_d + pull(r, -W) * m_u

    # out = (9*x - box) / w_hpf  ==  (8*x - neighbours) / w_hpf
    if c_scale == 1.0:     # trace-time branch: skip the extra multiply
        out = c_center * xf - b
    else:
        out = c_center * xf - c_scale * b
    o_ref[...] = out.astype(o_ref.dtype)


def _tpu_vmem_capacity():
    """(vmem_capacity_bytes, detected?) with a conservative 64 MiB fallback."""
    try:
        info = pltpu.get_tpu_info()
        cap = getattr(info, "vmem_capacity_bytes", None)
        if cap:
            return int(cap), True
    except Exception:
        pass
    return 64 * 1024 * 1024, False


def _pick_block_planes(num_planes, plane_bytes, target_bytes, sublane):
    """Planes per grid step: ~target-sized blocks, sublane multiple, balanced."""
    cb = max(1, int(target_bytes) // int(plane_bytes))
    if cb >= num_planes:
        return int(num_planes)                 # full extent is always legal
    cb = max(sublane, (cb // sublane) * sublane)
    if cb >= num_planes:
        return int(num_planes)
    # Balance block sizes so the last grid step is not a tiny remainder.
    nblk = -(-num_planes // cb)
    cb = -(-num_planes // nblk)
    cb = -(-cb // sublane) * sublane
    return int(min(cb, num_planes))


def highpass(x, w_hpf=1.0, *, block_planes=None):
    """x: (N, C, H, W) -> (N, C, H, W); fixed 3x3 high-pass scaled by 1/w_hpf."""
    N, C, H, W = x.shape
    P, HW = N * C, H * W
    HWp = -(-HW // 128) * 128                  # pad flattened plane to lanes

    xf = x.reshape(P, HW)
    if HWp != HW:
        xf = jnp.pad(xf, ((0, 0), (0, HWp - HW)))

    # Rank-1 {0,1} boundary masks over the flattened (padded) plane.
    p = jnp.arange(HWp, dtype=jnp.int32)
    col = p % W
    row = p // W
    masks = jnp.stack([
        col < (W - 1),     # right neighbour exists
        col > 0,           # left  neighbour exists
        row < (H - 1),     # lower neighbour exists
        row > 0,           # upper neighbour exists
    ]).astype(jnp.float32)                      # (4, HWp)

    itemsize = jnp.dtype(x.dtype).itemsize
    cap, detected = _tpu_vmem_capacity()
    small_vmem = cap <= (72 << 20)              # v7x-like: 64 MiB per TC
    target_bytes = (2 << 20) if small_vmem else (4 << 20)
    vmem_limit = int(cap * 3 // 4)              # 48 MiB on v7x, 96 MiB on v5e/v6e

    sublane = max(8, 32 // itemsize)            # 8 f32 / 16 bf16 / 32 int8
    plane_bytes = HWp * itemsize
    cb = block_planes if block_planes is not None else _pick_block_planes(
        P, plane_bytes, target_bytes, sublane)
    grid = (-(-P // cb),)

    kernel = functools.partial(
        _highpass_kernel, W=W,
        c_center=float(9.0 / w_hpf), c_scale=float(1.0 / w_hpf))

    cost = pl.CostEstimate(
        flops=11 * P * HWp, transcendentals=0,
        bytes_accessed=2 * P * HWp * itemsize + masks.size * 4)

    def run(dim_sem):
        return pl.pallas_call(
            kernel,
            out_shape=jax.ShapeDtypeStruct((P, HWp), x.dtype),
            grid_spec=pltpu.PrefetchScalarGridSpec(
                num_scalar_prefetch=0,
                grid=grid,
                in_specs=[
                    pl.BlockSpec((cb, HWp), lambda i: (i, 0)),
                    # Resident masks: constant block index -> DMA'd only once.
                    pl.BlockSpec((4, HWp), lambda i: (0, 0)),
                ],
                out_specs=pl.BlockSpec((cb, HWp), lambda i: (i, 0)),
            ),
            compiler_params=pltpu.CompilerParams(
                dimension_semantics=dim_sem,
                vmem_limit_bytes=vmem_limit,
            ),
            cost_estimate=cost,
        )(xf, masks)

    core_parallel = getattr(pltpu, "CORE_PARALLEL", None)
    if detected and small_vmem and core_parallel is not None:
        # v7x: shard the plane axis across both TensorCores.
        try:
            out_flat = run((core_parallel,))
        except Exception:
            out_flat = run(("parallel",))
    else:
        out_flat = run(("parallel",))

    if HWp != HW:
        out_flat = out_flat[:, :HW]
    return out_flat.reshape(N, C, H, W)


def highpass_ref(x, w_hpf=1.0):
    """Pure-JAX reference: depthwise conv via lax.conv_general_dilated."""
    C = x.shape[1]
    filt = (jnp.array([[-1.0, -1.0, -1.0],
                       [-1.0,  8.0, -1.0],
                       [-1.0, -1.0, -1.0]], dtype=jnp.float32) / w_hpf)
    w = jnp.tile(filt[None, None, :, :], (C, 1, 1, 1))  # (C, 1, 3, 3)
    return jax.lax.conv_general_dilated(
        x.astype(jnp.float32), w,
        window_strides=(1, 1),
        padding=((1, 1), (1, 1)),
        dimension_numbers=("NCHW", "OIHW", "NCHW"),
        feature_group_count=C,
    ).astype(x.dtype)


if __name__ == "__main__":
    # The module's only parameter is w_hpf (the registered filter is fixed).
    w_hpf = 1.0
    key = jax.random.PRNGKey(0)

    # Primary shape (NCHW), as implied by the StarGAN v2 forward.
    x = jax.random.normal(key, (2, 4, 16, 16), dtype=jnp.float32)
    out = jax.block_until_ready(highpass(x, w_hpf))
    ref = highpass_ref(x, w_hpf)
    assert out.shape == x.shape and out.dtype == x.dtype
    assert jnp.allclose(out, ref, rtol=1e-5, atol=1e-5), "mismatch vs reference conv"

    # Secondary shape exercising the lane-padding path (H*W % 128 != 0) and a
    # plane count that is not a multiple of the block size.
    x2 = jax.random.normal(jax.random.PRNGKey(1), (3, 5, 10, 12), dtype=jnp.float32)
    out2 = jax.block_until_ready(highpass(x2, w_hpf))
    ref2 = highpass_ref(x2, w_hpf)
    assert jnp.allclose(out2, ref2, rtol=1e-5, atol=1e-5), "mismatch on padded shape"

    print("KERNEL_OK")
</pallas_src>

<mosaic_0001>
module attributes {stable_mosaic.version = 11 : i64} {
  func.func @_highpass_kernel(%arg0: i32, %arg1: memref<8x256xf32, #tpu.memory_space<vmem>>, %arg2: memref<4x256xf32, #tpu.memory_space<vmem>>, %arg3: memref<8x256xf32, #tpu.memory_space<vmem>>) attributes {dimension_semantics = [#tpu.dimension_semantics<parallel>], iteration_bounds = array<i64: 1>, scalar_prefetch = 0 : i64, scratch_operands = 0 : i64, tpu.core_type = #tpu.core_type<tc>, window_params = [{transform_indices = @transform_0, window_bounds = array<i64: 8, 256>}, {pipeline_mode = #tpu.pipeline_mode<synchronous>, transform_indices = @transform_1, window_bounds = array<i64: 4, 256>}, {transform_indices = @transform_2, window_bounds = array<i64: 8, 256>}]} {
    %c0 = arith.constant 0 : index
    %c0_0 = arith.constant 0 : index
    %0 = vector.load %arg1[%c0, %c0_0] : memref<8x256xf32, #tpu.memory_space<vmem>>, vector<8x256xf32>
    %c255_i32 = arith.constant 255 : i32
    %1 = tpu.dynamic_rotate %0 by %c255_i32 dim 1 : vector<8x256xf32>, i32 -> vector<8x256xf32>
    %c1_i32 = arith.constant 1 : i32
    %2 = tpu.dynamic_rotate %0 by %c1_i32 dim 1 : vector<8x256xf32>, i32 -> vector<8x256xf32>
    %c0_1 = arith.constant 0 : index
    %c0_2 = arith.constant 0 : index
    %3 = vector.load %arg2[%c0_1, %c0_2] : memref<4x256xf32, #tpu.memory_space<vmem>>, vector<4x256xf32>
    %4 = vector.extract_strided_slice %3 {offsets = [0, 0], sizes = [1, 256], strides = [1, 1]} : vector<4x256xf32> to vector<1x256xf32>
    %5 = vector.extract_strided_slice %3 {offsets = [1, 0], sizes = [1, 256], strides = [1, 1]} : vector<4x256xf32> to vector<1x256xf32>
    %6 = vector.extract_strided_slice %3 {offsets = [2, 0], sizes = [1, 256], strides = [1, 1]} : vector<4x256xf32> to vector<1x256xf32>
    %7 = vector.extract_strided_slice %3 {offsets = [3, 0], sizes = [1, 256], strides = [1, 1]} : vector<4x256xf32> to vector<1x256xf32>
    %8 = vector.broadcast %4 : vector<1x256xf32> to vector<8x256xf32>
    %9 = arith.mulf %1, %8 : vector<8x256xf32>
    %10 = arith.addf %0, %9 : vector<8x256xf32>
    %11 = vector.broadcast %5 : vector<1x256xf32> to vector<8x256xf32>
    %12 = arith.mulf %2, %11 : vector<8x256xf32>
    %13 = arith.addf %10, %12 : vector<8x256xf32>
    %c240_i32 = arith.constant 240 : i32
    %14 = tpu.dynamic_rotate %13 by %c240_i32 dim 1 : vector<8x256xf32>, i32 -> vector<8x256xf32>
    %15 = vector.broadcast %6 : vector<1x256xf32> to vector<8x256xf32>
    %16 = arith.mulf %14, %15 : vector<8x256xf32>
    %17 = arith.addf %13, %16 : vector<8x256xf32>
    %c16_i32 = arith.constant 16 : i32
    %18 = tpu.dynamic_rotate %13 by %c16_i32 dim 1 : vector<8x256xf32>, i32 -> vector<8x256xf32>
    %19 = vector.broadcast %7 : vector<1x256xf32> to vector<8x256xf32>
    %20 = arith.mulf %18, %19 : vector<8x256xf32>
    %21 = arith.addf %17, %20 : vector<8x256xf32>
    %cst = arith.constant 9.000000e+00 : f32
    %22 = vector.broadcast %cst : f32 to vector<8x256xf32>
    %23 = arith.mulf %22, %0 : vector<8x256xf32>
    %24 = arith.subf %23, %21 : vector<8x256xf32>
    %c0_3 = arith.constant 0 : index
    %c0_4 = arith.constant 0 : index
    %25 = vector.load %arg3[%c0_3, %c0_4] : memref<8x256xf32, #tpu.memory_space<vmem>>, vector<8x256xf32>
    tpu.vector_store %arg3[%c0_3, %c0_4], %24 {strides = array<i32>} : memref<8x256xf32, #tpu.memory_space<vmem>>, vector<8x256xf32>,
    return
  }
  func.func @transform_0(%arg0: i32) -> (i32, i32) {
    %c0_i32 = arith.constant 0 : i32
    %c0_i32_0 = arith.constant 0 : i32
    return %arg0, %c0_i32 : i32, i32
  }
  func.func @transform_1(%arg0: i32) -> (i32, i32) {
    %c0_i32 = arith.constant 0 : i32
    %c0_i32_0 = arith.constant 0 : i32
    %c0_i32_1 = arith.constant 0 : i32
    return %c0_i32, %c0_i32_0 : i32, i32
  }
  func.func @transform_2(%arg0: i32) -> (i32, i32) {
    %c0_i32 = arith.constant 0 : i32
    %c0_i32_0 = arith.constant 0 : i32
    return %arg0, %c0_i32 : i32, i32
  }
}

</mosaic_0001>

<bundles_post_ra>
// kernel: tpu_custom_call.1
= control target key start
LH: loop header
LB: loop body
LE: loop exit
PB: predicated region body
PF: predicated region fallthrough
CT: control target
= control target key end

     0   :  { %7 = vsyncpa [#allocation3], 0  ;;  %s329_s0 = inlined_call_operand.hbm [shape: f32[8,256], index: 0, kind: input, shape index: {}]   ;;  %s330_s1 = inlined_call_operand.hbm [shape: f32[4,256], index: 1, kind: input, shape index: {}]   ;;  %s331_s2 = inlined_call_operand.hbm [shape: f32[8,256], index: 2, kind: output, shape index: {}]  }
   0x1   :  { %8 = vsyncpa [#allocation6], 0 }
   0x2   :  { %9 = vsyncpa [#allocation4], 0  ;;  %s259_s9 = smov [#allocation2]   ;;  %s260_s11 = smov [#allocation5]  }
   0x3   :  { %s16_s10 = sshll.u32 %s259_s9, 4  ;;  %s26_s12 = sshll.u32 %s260_s11, 4  ;;  %s17_s10 = int_to_ptr.vmem [resolvable:$true] %s16_s10  ;;  %s27_s12 = int_to_ptr.vmem [resolvable:$true] %s26_s12 }
   0x4   :  { %s187_s15 = scalar_lea.hbm %s329_s0, 256 }
   0x5   :  { %p188_p0 = scmp.ne.s32.totalorder %s329_s0, %s187_s15  ;;  %p191_p1 = scmp.lt.u32.totalorder %s187_s15, %s329_s0 }
   0x7   :  { %p193_p2 = pnand %p191_p1, %p188_p0 }
   0x9   :  { %196 = shalt.err (!%p193_p2)
}
   0xa   :  { %s197_s20 = scalar_lea.vmem %s17_s10, 256  ;;  %p202_p4 = scmp.lt.s32.totalorder %s17_s10, %s17_s10 }
   0xb   :  { %p198_p3 = scmp.ne.s32.totalorder %s17_s10, %s197_s20  ;;  %p203_p5 = scmp.lt.s32.totalorder %s197_s20, %s197_s20 }
   0xd   :  { %p204_p6 = por %p203_p5, %p202_p4 }
   0xf   :  { %p205_p7 = pnand %p204_p6, %p198_p3 }
  0x11   :  { %208 = shalt.err (!%p205_p7)
}
  0x12   :  { %19 = dma.hbm_to_vmem [thread:$0]  %s329_s0, 256, %s17_s10, [#allocation3]  }
  0x13   :  { %s209_s25 = scalar_lea.hbm %s330_s1, 128 }
  0x14   :  { %p210_p8 = scmp.ne.s32.totalorder %s330_s1, %s209_s25  ;;  %p213_p9 = scmp.lt.u32.totalorder %s209_s25, %s330_s1 }
  0x16   :  { %p215_p10 = pnand %p213_p9, %p210_p8 }
  0x18   :  { %218 = shalt.err (!%p215_p10)
}
  0x19   :  { %s219_s30 = scalar_lea.vmem %s27_s12, 128  ;;  %p224_p12 = scmp.lt.s32.totalorder %s27_s12, %s27_s12 }
  0x1a   :  { %p220_p11 = scmp.ne.s32.totalorder %s27_s12, %s219_s30  ;;  %p225_p13 = scmp.lt.s32.totalorder %s219_s30, %s219_s30 }
  0x1c   :  { %p226_p0 = por %p225_p13, %p224_p12 }
  0x1e   :  { %p227_p1 = pnand %p226_p0, %p220_p11 }
  0x20   :  { %230 = shalt.err (!%p227_p1)
}
  0x21   :  { %29 = dma.hbm_to_vmem [thread:$0]  %s330_s1, 128, %s27_s12, [#allocation6]  }
  0x22   :  { %253 = dma.done.wait [#allocation3], 256  }
  0x23   :  { %254 = vsyncadd [#allocation3], 4294967040 }
  0x24   :  { %255 = dma.done.wait [#allocation6], 128  }
  0x25   :  { %256 = vsyncadd [#allocation6], 4294967168  ;;  %v305_v0 = vld [vmem:[#allocation2] sm:$0xff]  ;;  %s261_s4 = smov 1   ;;  %s262_s5 = smov 127   ;;  %v309_v1 = vld [vmem:[#allocation2 + $0x8] sm:$0xff]  ;;  %v42_v2 = vlaneseq }
  0x26   :  { %47 = vrot.lane.b32.xlu1 %v305_v0, %s261_s4  ;;  %38 = vrot.lane.b32.xlu0 %v305_v0, %s262_s5  ;;  %v54_v6 = vld [vmem:[#allocation5] sm:$0xff]  ;;  %s263_s1 = smov 112   ;;  %s264_s6 = smov 16   ;;  %v158_v56 = vmul.f32 9.0, %v305_v0  ;;  %v159_v57 = vmul.f32 9.0, %v309_v1 }
  0x27   :  { %v57_v3 = vshrl.u32 %v42_v2, 7  ;;  %v43_v9 = vand.u32 127, %v42_v2  ;;  %s265_s7 = smov [#allocation7]  }
  0x28   :  { %s170_s8 = sshll.u32 %s265_s7, 4  ;;  %s171_s8 = int_to_ptr.vmem [resolvable:$true] %s170_s8 }
  0x29   :  { %v58_v4 = vsub.s32 0, %v57_v3  ;;  %v62_v5 = vsub.s32 4, %v57_v3  ;;  %v80_v7 = vsub.s32 1, %v57_v3  ;;  %v84_v8 = vsub.s32 5, %v57_v3  ;;  %s231_s9 = scalar_lea.vmem %s171_s8, 256  ;;  %p236_p3 = scmp.lt.s32.totalorder %s171_s8, %s171_s8 }
  0x2a   :  { %49 = vrot.lane.b32.xlu1 %v309_v1, %s261_s4  ;;  %40 = vrot.lane.b32.xlu0 %v309_v1, %s262_s5  ;;  %vm51_vm0 = vcmp.lt.s32.totalorder %v43_v9, 1  ;;  %vm44_vm1 = vcmp.lt.s32.totalorder %v43_v9, 127  ;;  %v109_v34 = vsub.s32 2, %v57_v3  ;;  %v113_v35 = vsub.s32 6, %v57_v3  ;;  %p232_p2 = scmp.ne.s32.totalorder %s171_s8, %s231_s9  ;;  %p237_p4 = scmp.lt.s32.totalorder %s231_s9, %s231_s9 }
  0x2b   :  { %v59_v10 = vrot.slane %v54_v6, %v58_v4  ;;  %v63_v11 = vrot.slane %v54_v6, %v62_v5  ;;  %v81_v14 = vrot.slane %v54_v6, %v80_v7  ;;  %v85_v15 = vrot.slane %v54_v6, %v84_v8 }
  0x2c   :  { %v110_v36 = vrot.slane %v54_v6, %v109_v34  ;;  %v114_v37 = vrot.slane %v54_v6, %v113_v35  ;;  %v138_v38 = vsub.s32 3, %v57_v3  ;;  %v142_v39 = vsub.s32 7, %v57_v3  ;;  %p238_p5 = por %p237_p4, %p236_p3 }
  0x2d   :  { %v69_v16 = vrot.slane %v59_v10, %v58_v4  ;;  %v73_v17 = vrot.slane %v63_v11, %v58_v4  ;;  %v91_v18 = vrot.slane %v81_v14, %v80_v7  ;;  %v95_v19 = vrot.slane %v85_v15, %v80_v7 }
  0x2e   :  { %vm104_vm2 = vcmp.lt.s32.totalorder %v43_v9, 112  ;;  %v120_v40 = vrot.slane %v110_v36, %v109_v34  ;;  %v124_v41 = vrot.slane %v114_v37, %v109_v34  ;;  %v139_v42 = vrot.slane %v54_v6, %v138_v38  ;;  %p239_p6 = pnand %p238_p5, %p232_p2 }
  0x2f   :  { %v143_v43 = vrot.slane %v54_v6, %v142_v39  ;;  %vm133_vm3 = vcmp.lt.s32.totalorder %v43_v9, 16 }
  0x30   :  { %v149_v50 = vrot.slane %v139_v42, %v138_v38 }
  0x31   :  { %v153_v51 = vrot.slane %v143_v43, %v138_v38 }
  0x98   :  { %v48_v12 = vpop.permute.xlu1 %47  ;;  %v39_v13 = vpop.permute.xlu0 %38 }
  0x9c   :  { %v50_v20 = vpop.permute.xlu1 %49  ;;  %v41_v21 = vpop.permute.xlu0 %40 }
  0x9d   :  { %v52_v22 = vsel %vm51_vm0, %v48_v12, %v50_v20  ;;  %v53_v23 = vsel %vm51_vm0, %v50_v20, %v48_v12  ;;  %v45_v24 = vsel %vm44_vm1, %v39_v13, %v41_v21  ;;  %v46_v25 = vsel %vm44_vm1, %v41_v21, %v39_v13 }
  0x9e   :  { %v74_v26 = vmul.f32 %v69_v16, %v45_v24  ;;  %v75_v27 = vmul.f32 %v73_v17, %v46_v25  ;;  %v96_v28 = vmul.f32 %v91_v18, %v53_v23  ;;  %v97_v29 = vmul.f32 %v95_v19, %v52_v22 }
  0xa0   :  { %v76_v30 = vadd.f32 %v74_v26, %v305_v0  ;;  %v77_v31 = vadd.f32 %v75_v27, %v309_v1 }
  0xa2   :  { %v99_v32 = vadd.f32 %v97_v29, %v77_v31  ;;  %v98_v33 = vadd.f32 %v96_v28, %v76_v30 }
  0xa4   :  { %102 = vrot.lane.b32.xlu1 %v99_v32, %s263_s1  ;;  %100 = vrot.lane.b32.xlu0 %v98_v33, %s263_s1 }
  0xa8   :  { %131 = vrot.lane.b32.xlu1 %v99_v32, %s264_s6  ;;  %129 = vrot.lane.b32.xlu0 %v98_v33, %s264_s6 }
 0x116   :  { %v103_v44 = vpop.permute.xlu1 %102  ;;  %v101_v45 = vpop.permute.xlu0 %100 }
 0x117   :  { %v105_v46 = vsel %vm104_vm2, %v101_v45, %v103_v44  ;;  %v106_v47 = vsel %vm104_vm2, %v103_v44, %v101_v45 }
 0x118   :  { %v125_v48 = vmul.f32 %v120_v40, %v105_v46  ;;  %v126_v49 = vmul.f32 %v124_v41, %v106_v47 }
 0x11a   :  { %v132_v52 = vpop.permute.xlu1 %131  ;;  %v130_v53 = vpop.permute.xlu0 %129  ;;  %v127_v58 = vadd.f32 %v125_v48, %v98_v33  ;;  %v128_v59 = vadd.f32 %v126_v49, %v99_v32 }
 0x11b   :  { %v134_v54 = vsel %vm133_vm3, %v130_v53, %v132_v52  ;;  %v135_v55 = vsel %vm133_vm3, %v132_v52, %v130_v53 }
 0x11c   :  { %v154_v60 = vmul.f32 %v149_v50, %v135_v55  ;;  %v155_v61 = vmul.f32 %v153_v51, %v134_v54 }
 0x11e   :  { %v156_v62 = vadd.f32 %v154_v60, %v127_v58  ;;  %v157_v63 = vadd.f32 %v155_v61, %v128_v59 }
 0x120   :  { %v160_v2 = vsub.f32 %v158_v56, %v156_v62  ;;  %v161_v3 = vsub.f32 %v159_v57, %v157_v63 }
 0x122   :  { %162 = vst [vmem:[#allocation7] sm:$0xff] %v160_v2  ;;  %163 = vst [vmem:[#allocation7 + $0x8] sm:$0xff] %v161_v3 }
 0x123   :  { %242 = shalt.err (!%p239_p6)
}
 0x124   :  { %s243_s12 = scalar_lea.hbm %s331_s2, 256 }
 0x125   :  { %p244_p7 = scmp.ne.s32.totalorder %s331_s2, %s243_s12  ;;  %p247_p8 = scmp.lt.u32.totalorder %s243_s12, %s331_s2 }
 0x127   :  { %p249_p9 = pnand %p247_p8, %p244_p7 }
 0x129   :  { %252 = shalt.err (!%p249_p9)
}
 0x12a   :  { %173 = dma.vmem_to_hbm [thread:$0]  %s171_s8, 256, %s331_s2, [#allocation4]  }
 0x12b   :  { %257 = dma.done.wait [#allocation4], 256  }
 0x12c   :  { %258 = vsyncadd [#allocation4], 4294967040 }
 0x12d   :  { %177 = vsyncpa [#allocation3], 1 }
 0x12e   :  { %178 = vsyncpa [#allocation6], 1 }
 0x12f   :  { %179 = vsyncpa [#allocation4], 1 }

</bundles_post_ra>
